<compile_context>
chip_gen: v6e
topology: v6e:2x2x1
jax: 0.10.0
libtpu: 0.0.40
codegen_flags: <defaults>
</compile_context>

<pallas_src>
import numpy as np
import jax
import jax.numpy as jnp
from jax.experimental import pallas as pl
from jax.experimental.pallas import tpu as pltpu

_LN_EPS = 1e-5
_SMOOTH_SIGMA = 2  # smooth_tensor_1d(..., 2) in the reference forward


def _gauss_weights(sigma):
    k = np.arange(-sigma, sigma + 1, dtype=np.float32)
    w = np.exp(-0.5 * (k / sigma) ** 2)
    return (w / w.sum()).astype(np.float32)


_SMOOTH_W = _gauss_weights(_SMOOTH_SIGMA)


# --------------------------------------------------------------------------
# Pallas kernel
# --------------------------------------------------------------------------
def _attention_head_kernel(x_ref,        # (Bt, L, HD)   activations
                           params_ref,   # (3, HD)       [gamma; beta; head-0 Q (zero padded)]
                           expand_ref,   # (H, HD)       0/1 head selector (row h marks head h's cols)
                           masks_ref,    # (Bt, 2, L)    [:,0,:]=t<length, [:,1,:]=np_mask
                           out_ref,      # (Bt, 1, HD)   pooled output
                           attn_ref,     # (Bt, 1, L)    attention weights
                           pad_ref):     # (Bt, 1, L+2S) smoothing scratch (VMEM)
    bt, L, HD = x_ref.shape
    H = expand_ref.shape[0]
    D = HD // H
    S = _SMOOTH_SIGMA

    x = x_ref[...]                                        # (Bt, L, HD) f32
    gamma = params_ref[0:1, :]                            # (1, HD)
    beta = params_ref[1:2, :]
    q0 = params_ref[2:3, :]                               # head-0 Q row, zero elsewhere
    expd = jnp.broadcast_to(expand_ref[...], (bt, H, HD))

    # Grouped LayerNorm: per-head mean / var via the small 0/1 head selector
    # ((Bt,L,HD) x (Bt,H,HD) -> (Bt,L,H)), then broadcast back with the same
    # selector.  Default matmul precision, f32 accumulation.
    inv_d = 1.0 / D
    mean_h = jnp.einsum('blc,bhc->blh', x, expd,
                        preferred_element_type=jnp.float32) * inv_d
    mean_b = jnp.einsum('blh,bhc->blc', mean_h, expd,
                        preferred_element_type=jnp.float32)
    xc = x - mean_b
    var_h = jnp.einsum('blc,bhc->blh', xc * xc, expd,
                       preferred_element_type=jnp.float32) * inv_d
    inv_b = jnp.einsum('blh,bhc->blc', jax.lax.rsqrt(var_h + _LN_EPS), expd,
                       preferred_element_type=jnp.float32)
    x_ln = xc * inv_b * gamma + beta                      # (Bt, L, HD)

    # Head-0 score on the VPU/XLU: elementwise multiply + lane reduction.
    score = jnp.sum(x_ln * q0, axis=-1)                   # (Bt, L)

    # Length-masked, zero-padded 5-tap Gaussian smoothing: write the masked
    # scores into the middle of a zeroed scratch row and take an unrolled
    # shifted weighted sum (equivalent to the per-sequence
    # F.pad(smooth_tensor_1d(mul[i, :len_i, 0]), ...) loop of the reference).
    vm2 = masks_ref[:, 0, :]                              # (Bt, L)
    vm3 = masks_ref[:, 0:1, :]                            # (Bt, 1, L)
    nm3 = masks_ref[:, 1:2, :]                            # (Bt, 1, L)
    score = jnp.where(vm2 > 0.5, score, 0.0)
    pad_ref[...] = jnp.zeros((bt, 1, L + 2 * S), jnp.float32)
    pad_ref[:, 0, S:S + L] = score
    sm = jnp.zeros((bt, 1, L), jnp.float32)
    for j in range(2 * S + 1):                            # static 5-tap unroll
        sm = sm + float(_SMOOTH_W[j]) * pad_ref[:, :, j:j + L]
    sm = jnp.where(vm3 > 0.5, sm, 0.0)

    # masked_fill(~np_mask, -inf) + softmax over the sequence axis.
    # TODO(synk): an all-False np_mask row yields NaN (0/0), same as the reference.
    logits = jnp.where(nm3 > 0.5, sm, -jnp.inf)
    mx = jnp.max(logits, axis=-1, keepdims=True)
    e = jnp.exp(logits - mx)
    attn = e / jnp.sum(e, axis=-1, keepdims=True)         # (Bt, 1, L)
    attn_ref[...] = attn

    # Attention-weighted pooling, batched over Bt: (Bt,1,L) @ (Bt,L,HD) -> (Bt,1,HD).
    out_ref[...] = jnp.einsum('bql,bld->bqd', attn, x_ln,
                              preferred_element_type=jnp.float32)


# --------------------------------------------------------------------------
# Glue: parameter init and pallas_call wrapper
# --------------------------------------------------------------------------
def init_attention_head_params(key, hidden_dim, n_heads):
    d = hidden_dim // n_heads
    # torch.nn.init.normal_(Q.weight, mean=0.0, std=1/(hidden_dim//n_heads))
    qw = jax.random.normal(key, (n_heads, d), dtype=jnp.float32) * (1.0 / d)
    gamma = jnp.ones((d,), jnp.float32)   # LayerNorm default affine init
    beta = jnp.zeros((d,), jnp.float32)
    return {"q_weight": qw, "ln_gamma": gamma, "ln_beta": beta}


def attention_head_forward(x, np_mask, lengths, q_weight, ln_gamma, ln_beta,
                           *, block_b=8, vmem_limit_bytes=None):
    """Pallas forward.  block_b = sequences per grid step; size it so that
    2 * block_b * L * HD * 4 bytes stays well under the scoped VMEM limit
    (halve it on v7x, raise vmem_limit_bytes on v6e for large L*HD)."""
    x = x.astype(jnp.float32)
    B, L, HD = x.shape
    H, D = q_weight.shape
    assert H * D == HD

    bt = max(1, min(block_b, B))
    while B % bt:                 # keep the grid exact for simplicity
        bt -= 1

    # 0/1 head selector: row h is 1 on head h's D contiguous columns.
    head_of_col = np.arange(HD) // D
    expand = jnp.asarray(
        (np.arange(H)[:, None] == head_of_col[None, :]).astype(np.float32))   # (H, HD)

    # Merged small params: [gamma (tiled per head); beta; head-0 Q (zero padded)].
    gamma_full = jnp.tile(ln_gamma.astype(jnp.float32), H)
    beta_full = jnp.tile(ln_beta.astype(jnp.float32), H)
    q0_full = jnp.zeros((HD,), jnp.float32).at[:D].set(q_weight[0].astype(jnp.float32))
    params = jnp.stack([gamma_full, beta_full, q0_full], axis=0)               # (3, HD)

    # Merged per-sequence masks: [:,0,:] = (t < length), [:,1,:] = np_mask.
    pos = jnp.arange(L, dtype=jnp.int32)[None, :]
    valid = (pos < lengths.astype(jnp.int32)[:, None]).astype(jnp.float32)
    masks = jnp.stack([valid, np_mask.astype(jnp.float32)], axis=1)            # (B, 2, L)

    pooled, attns = pl.pallas_call(
        _attention_head_kernel,
        out_shape=(jax.ShapeDtypeStruct((B, 1, HD), jnp.float32),
                   jax.ShapeDtypeStruct((B, 1, L), jnp.float32)),
        grid=(B // bt,),
        in_specs=[
            pl.BlockSpec((bt, L, HD), lambda i: (i, 0, 0)),   # x
            pl.BlockSpec((3, HD), lambda i: (0, 0)),          # merged params
            pl.BlockSpec((H, HD), lambda i: (0, 0)),          # head selector
            pl.BlockSpec((bt, 2, L), lambda i: (i, 0, 0)),    # merged masks
        ],
        out_specs=(
            pl.BlockSpec((bt, 1, HD), lambda i: (i, 0, 0)),   # pooled
            pl.BlockSpec((bt, 1, L), lambda i: (i, 0, 0)),    # attention weights
        ),
        scratch_shapes=[pltpu.VMEM((bt, 1, L + 2 * _SMOOTH_SIGMA), jnp.float32)],
        compiler_params=pltpu.CompilerParams(
            dimension_semantics=("parallel",),                # shard batch grid over TCs
            vmem_limit_bytes=vmem_limit_bytes),
    )(x, params, expand, masks)

    return pooled.reshape(B, HD), attns.reshape(B, L)


# --------------------------------------------------------------------------
# Pure-numpy reference (mirrors the PyTorch forward semantics)
# --------------------------------------------------------------------------
def _reference_forward(x, np_mask, lengths, qw, gamma, beta, sigma=_SMOOTH_SIGMA):
    x = np.asarray(x, np.float64)
    B, L, hidden = x.shape
    H, D = qw.shape
    xg = x.reshape(B, L, H, D)
    mean = xg.mean(-1, keepdims=True)
    var = ((xg - mean) ** 2).mean(-1, keepdims=True)
    x_ln = (xg - mean) / np.sqrt(var + _LN_EPS) * gamma + beta
    mul = (x_ln * qw[None, None]).sum(-1)                 # (B, L, H)

    w = np.asarray(_gauss_weights(sigma), np.float64)
    scores = np.zeros((B, L))
    for i in range(B):
        Li = int(lengths[i])
        s = mul[i, :Li, 0]
        for t in range(Li):
            acc = 0.0
            for kk in range(-sigma, sigma + 1):
                j = t + kk
                if 0 <= j < Li:
                    acc += w[kk + sigma] * s[j]
            scores[i, t] = acc
    scores = np.where(np.asarray(np_mask), scores, -np.inf)
    mx = scores.max(axis=1, keepdims=True)
    e = np.exp(scores - mx)
    attn = e / e.sum(axis=1, keepdims=True)
    pooled = (x_ln * attn[:, :, None, None]).sum(1).reshape(B, hidden)
    return pooled, attn


# --------------------------------------------------------------------------
if __name__ == "__main__":
    B, L, hidden, n_heads = 2, 8, 32, 4
    key = jax.random.PRNGKey(0)
    kx, kq = jax.random.split(key)

    params = init_attention_head_params(kq, hidden, n_heads)
    x = jax.random.normal(kx, (B, L, hidden), dtype=jnp.float32)
    lengths = jnp.array([8, 5], dtype=jnp.int32)
    pos = jnp.arange(L)[None, :]
    np_mask = pos < lengths[:, None]
    np_mask = np_mask.at[0, 1].set(False)   # np_mask need not equal the length mask

    pooled, attns = attention_head_forward(
        x, np_mask, lengths,
        params["q_weight"], params["ln_gamma"], params["ln_beta"])
    jax.block_until_ready((pooled, attns))

    ref_pooled, ref_attns = _reference_forward(
        np.asarray(x), np.asarray(np_mask), np.asarray(lengths),
        np.asarray(params["q_weight"]), np.asarray(params["ln_gamma"]),
        np.asarray(params["ln_beta"]))

    # Default (reduced-precision) MXU matmuls with f32 accumulation -> compare
    # against the float64 reference with a correspondingly relaxed tolerance.
    assert np.allclose(np.asarray(pooled), ref_pooled, atol=2e-2, rtol=2e-2)
    assert np.allclose(np.asarray(attns), ref_attns, atol=2e-2, rtol=2e-2)
    print("KERNEL_OK")
</pallas_src>

<mosaic_0001>
module attributes {stable_mosaic.version = 11 : i64} {
  func.func @_attention_head_kernel(%arg0: i32, %arg1: memref<2x8x32xf32, #tpu.memory_space<vmem>>, %arg2: memref<3x32xf32, #tpu.memory_space<vmem>>, %arg3: memref<4x32xf32, #tpu.memory_space<vmem>>, %arg4: memref<2x2x8xf32, #tpu.memory_space<vmem>>, %arg5: memref<2x1x32xf32, #tpu.memory_space<vmem>>, %arg6: memref<2x1x8xf32, #tpu.memory_space<vmem>>, %arg7: memref<2x1x12xf32, #tpu.memory_space<vmem>>) attributes {dimension_semantics = [#tpu.dimension_semantics<parallel>], iteration_bounds = array<i64: 1>, scalar_prefetch = 0 : i64, scratch_operands = 1 : i64, tpu.core_type = #tpu.core_type<tc>, window_params = [{transform_indices = @transform_0, window_bounds = array<i64: 2, 8, 32>}, {pipeline_mode = #tpu.pipeline_mode<synchronous>, transform_indices = @transform_1, window_bounds = array<i64: 3, 32>}, {pipeline_mode = #tpu.pipeline_mode<synchronous>, transform_indices = @transform_2, window_bounds = array<i64: 4, 32>}, {transform_indices = @transform_3, window_bounds = array<i64: 2, 2, 8>}, {transform_indices = @transform_4, window_bounds = array<i64: 2, 1, 32>}, {transform_indices = @transform_5, window_bounds = array<i64: 2, 1, 8>}]} {
    %c0 = arith.constant 0 : index
    %c0_0 = arith.constant 0 : index
    %c0_1 = arith.constant 0 : index
    %0 = vector.load %arg1[%c0, %c0_0, %c0_1] : memref<2x8x32xf32, #tpu.memory_space<vmem>>, vector<2x8x32xf32>
    %c0_2 = arith.constant 0 : index
    %c0_3 = arith.constant 0 : index
    %1 = vector.load %arg2[%c0_2, %c0_3] : memref<3x32xf32, #tpu.memory_space<vmem>>, vector<1x32xf32>
    %c1 = arith.constant 1 : index
    %c0_4 = arith.constant 0 : index
    %2 = vector.load %arg2[%c1, %c0_4] : memref<3x32xf32, #tpu.memory_space<vmem>>, vector<1x32xf32>
    %c2 = arith.constant 2 : index
    %c0_5 = arith.constant 0 : index
    %3 = vector.load %arg2[%c2, %c0_5] : memref<3x32xf32, #tpu.memory_space<vmem>>, vector<1x32xf32>
    %c0_6 = arith.constant 0 : index
    %c0_7 = arith.constant 0 : index
    %4 = vector.load %arg3[%c0_6, %c0_7] : memref<4x32xf32, #tpu.memory_space<vmem>>, vector<4x32xf32>
    %5 = vector.shape_cast %4 : vector<4x32xf32> to vector<1x4x32xf32>
    %6 = vector.broadcast %5 : vector<1x4x32xf32> to vector<2x4x32xf32>
    "tpu.trace_start"() <{level = 10 : i32, message = "blc,bhc->blh"}> : () -> ()
    %cst = arith.constant dense<0.000000e+00> : vector<2x8x4xf32>
    %7 = tpu.matmul %0, %6, %cst {dimension_numbers = #tpu.dot_dimension_numbers<[2], [2], [1], [1], [0, 0, 0, 1, 1, 1], [0], [0]>} : vector<2x8x32xf32>, vector<2x4x32xf32>, vector<2x8x4xf32> -> vector<2x8x4xf32>
    "tpu.trace_stop"() : () -> ()
    %cst_8 = arith.constant 1.250000e-01 : f32
    %8 = vector.broadcast %cst_8 : f32 to vector<2x8x4xf32>
    %9 = arith.mulf %7, %8 : vector<2x8x4xf32>
    "tpu.trace_start"() <{level = 10 : i32, message = "blh,bhc->blc"}> : () -> ()
    %cst_9 = arith.constant dense<0.000000e+00> : vector<2x8x32xf32>
    %10 = tpu.matmul %9, %6, %cst_9 {dimension_numbers = #tpu.dot_dimension_numbers<[2], [1], [1], [2], [0, 0, 0, 1, 1, 2], [0], [0]>} : vector<2x8x4xf32>, vector<2x4x32xf32>, vector<2x8x32xf32> -> vector<2x8x32xf32>
    "tpu.trace_stop"() : () -> ()
    %11 = arith.subf %0, %10 : vector<2x8x32xf32>
    %12 = arith.mulf %11, %11 : vector<2x8x32xf32>
    "tpu.trace_start"() <{level = 10 : i32, message = "blc,bhc->blh"}> : () -> ()
    %cst_10 = arith.constant dense<0.000000e+00> : vector<2x8x4xf32>
    %13 = tpu.matmul %12, %6, %cst_10 {dimension_numbers = #tpu.dot_dimension_numbers<[2], [2], [1], [1], [0, 0, 0, 1, 1, 1], [0], [0]>} : vector<2x8x32xf32>, vector<2x4x32xf32>, vector<2x8x4xf32> -> vector<2x8x4xf32>
    "tpu.trace_stop"() : () -> ()
    %cst_11 = arith.constant 1.250000e-01 : f32
    %14 = vector.broadcast %cst_11 : f32 to vector<2x8x4xf32>
    %15 = arith.mulf %13, %14 : vector<2x8x4xf32>
    %cst_12 = arith.constant 9.99999974E-6 : f32
    %16 = vector.broadcast %cst_12 : f32 to vector<2x8x4xf32>
    %17 = arith.addf %15, %16 : vector<2x8x4xf32>
    %18 = math.rsqrt %17 : vector<2x8x4xf32>
    "tpu.trace_start"() <{level = 10 : i32, message = "blh,bhc->blc"}> : () -> ()
    %cst_13 = arith.constant dense<0.000000e+00> : vector<2x8x32xf32>
    %19 = tpu.matmul %18, %6, %cst_13 {dimension_numbers = #tpu.dot_dimension_numbers<[2], [1], [1], [2], [0, 0, 0, 1, 1, 2], [0], [0]>} : vector<2x8x4xf32>, vector<2x4x32xf32>, vector<2x8x32xf32> -> vector<2x8x32xf32>
    "tpu.trace_stop"() : () -> ()
    %20 = arith.mulf %11, %19 : vector<2x8x32xf32>
    %21 = vector.shape_cast %1 : vector<1x32xf32> to vector<1x1x32xf32>
    %22 = vector.broadcast %21 : vector<1x1x32xf32> to vector<2x8x32xf32>
    %23 = arith.mulf %20, %22 : vector<2x8x32xf32>
    %24 = vector.shape_cast %2 : vector<1x32xf32> to vector<1x1x32xf32>
    %25 = vector.broadcast %24 : vector<1x1x32xf32> to vector<2x8x32xf32>
    %26 = arith.addf %23, %25 : vector<2x8x32xf32>
    %27 = vector.shape_cast %3 : vector<1x32xf32> to vector<1x1x32xf32>
    %28 = vector.broadcast %27 : vector<1x1x32xf32> to vector<2x8x32xf32>
    %29 = arith.mulf %26, %28 : vector<2x8x32xf32>
    %cst_14 = arith.constant dense<0.000000e+00> : vector<2x8xf32>
    %30 = vector.multi_reduction <add>, %29, %cst_14 [2] : vector<2x8x32xf32> to vector<2x8xf32>
    %c0_15 = arith.constant 0 : index
    %c0_16 = arith.constant 0 : index
    %c0_17 = arith.constant 0 : index
    %31 = vector.load %arg4[%c0_15, %c0_16, %c0_17] : memref<2x2x8xf32, #tpu.memory_space<vmem>>, vector<2x1x8xf32>
    %32 = vector.shape_cast %31 : vector<2x1x8xf32> to vector<2x8xf32>
    %c0_18 = arith.constant 0 : index
    %c0_19 = arith.constant 0 : index
    %c0_20 = arith.constant 0 : index
    %33 = vector.load %arg4[%c0_18, %c0_19, %c0_20] : memref<2x2x8xf32, #tpu.memory_space<vmem>>, vector<2x1x8xf32>
    %c0_21 = arith.constant 0 : index
    %c1_22 = arith.constant 1 : index
    %c0_23 = arith.constant 0 : index
    %34 = vector.load %arg4[%c0_21, %c1_22, %c0_23] : memref<2x2x8xf32, #tpu.memory_space<vmem>>, vector<2x1x8xf32>
    %cst_24 = arith.constant 5.000000e-01 : f32
    %35 = vector.broadcast %cst_24 : f32 to vector<2x8xf32>
    %36 = arith.cmpf ogt, %32, %35 : vector<2x8xf32>
    %cst_25 = arith.constant 0.000000e+00 : f32
    %37 = vector.broadcast %cst_25 : f32 to vector<2x8xf32>
    %38 = arith.select %36, %30, %37 : vector<2x8xi1>, vector<2x8xf32>
    %cst_26 = arith.constant 0.000000e+00 : f32
    %39 = vector.broadcast %cst_26 : f32 to vector<2x1x12xf32>
    %c0_27 = arith.constant 0 : index
    %c0_28 = arith.constant 0 : index
    %c0_29 = arith.constant 0 : index
    %40 = vector.load %arg7[%c0_27, %c0_28, %c0_29] : memref<2x1x12xf32, #tpu.memory_space<vmem>>, vector<2x1x12xf32>
    tpu.vector_store %arg7[%c0_27, %c0_28, %c0_29], %39 {strides = array<i32>} : memref<2x1x12xf32, #tpu.memory_space<vmem>>, vector<2x1x12xf32>,
    %c0_30 = arith.constant 0 : index
    %c0_31 = arith.constant 0 : index
    %c2_32 = arith.constant 2 : index
    %41 = vector.load %arg7[%c0_30, %c0_31, %c2_32] : memref<2x1x12xf32, #tpu.memory_space<vmem>>, vector<2x1x8xf32>
    %42 = vector.shape_cast %41 : vector<2x1x8xf32> to vector<2x8xf32>
    %43 = vector.shape_cast %38 : vector<2x8xf32> to vector<2x1x8xf32>
    tpu.vector_store %arg7[%c0_30, %c0_31, %c2_32], %43 {strides = array<i32>} : memref<2x1x12xf32, #tpu.memory_space<vmem>>, vector<2x1x8xf32>,
    %cst_33 = arith.constant 0.000000e+00 : f32
    %44 = vector.broadcast %cst_33 : f32 to vector<2x1x8xf32>
    %c0_34 = arith.constant 0 : index
    %c0_35 = arith.constant 0 : index
    %c0_36 = arith.constant 0 : index
    %45 = vector.load %arg7[%c0_34, %c0_35, %c0_36] : memref<2x1x12xf32, #tpu.memory_space<vmem>>, vector<2x1x8xf32>
    %cst_37 = arith.constant 0.152469143 : f32
    %46 = vector.broadcast %cst_37 : f32 to vector<2x1x8xf32>
    %47 = arith.mulf %46, %45 : vector<2x1x8xf32>
    %48 = arith.addf %44, %47 : vector<2x1x8xf32>
    %c0_38 = arith.constant 0 : index
    %c0_39 = arith.constant 0 : index
    %c1_40 = arith.constant 1 : index
    %49 = vector.load %arg7[%c0_38, %c0_39, %c1_40] : memref<2x1x12xf32, #tpu.memory_space<vmem>>, vector<2x1x8xf32>
    %cst_41 = arith.constant 0.221841305 : f32
    %50 = vector.broadcast %cst_41 : f32 to vector<2x1x8xf32>
    %51 = arith.mulf %50, %49 : vector<2x1x8xf32>
    %52 = arith.addf %48, %51 : vector<2x1x8xf32>
    %c0_42 = arith.constant 0 : index
    %c0_43 = arith.constant 0 : index
    %c2_44 = arith.constant 2 : index
    %53 = vector.load %arg7[%c0_42, %c0_43, %c2_44] : memref<2x1x12xf32, #tpu.memory_space<vmem>>, vector<2x1x8xf32>
    %cst_45 = arith.constant 0.251379132 : f32
    %54 = vector.broadcast %cst_45 : f32 to vector<2x1x8xf32>
    %55 = arith.mulf %54, %53 : vector<2x1x8xf32>
    %56 = arith.addf %52, %55 : vector<2x1x8xf32>
    %c0_46 = arith.constant 0 : index
    %c0_47 = arith.constant 0 : index
    %c3 = arith.constant 3 : index
    %57 = vector.load %arg7[%c0_46, %c0_47, %c3] : memref<2x1x12xf32, #tpu.memory_space<vmem>>, vector<2x1x8xf32>
    %cst_48 = arith.constant 0.221841305 : f32
    %58 = vector.broadcast %cst_48 : f32 to vector<2x1x8xf32>
    %59 = arith.mulf %58, %57 : vector<2x1x8xf32>
    %60 = arith.addf %56, %59 : vector<2x1x8xf32>
    %c0_49 = arith.constant 0 : index
    %c0_50 = arith.constant 0 : index
    %c4 = arith.constant 4 : index
    %61 = vector.load %arg7[%c0_49, %c0_50, %c4] : memref<2x1x12xf32, #tpu.memory_space<vmem>>, vector<2x1x8xf32>
    %cst_51 = arith.constant 0.152469143 : f32
    %62 = vector.broadcast %cst_51 : f32 to vector<2x1x8xf32>
    %63 = arith.mulf %62, %61 : vector<2x1x8xf32>
    %64 = arith.addf %60, %63 : vector<2x1x8xf32>
    %cst_52 = arith.constant 5.000000e-01 : f32
    %65 = vector.broadcast %cst_52 : f32 to vector<2x1x8xf32>
    %66 = arith.cmpf ogt, %33, %65 : vector<2x1x8xf32>
    %cst_53 = arith.constant 0.000000e+00 : f32
    %67 = vector.broadcast %cst_53 : f32 to vector<2x1x8xf32>
    %68 = arith.select %66, %64, %67 : vector<2x1x8xi1>, vector<2x1x8xf32>
    %cst_54 = arith.constant 5.000000e-01 : f32
    %69 = vector.broadcast %cst_54 : f32 to vector<2x1x8xf32>
    %70 = arith.cmpf ogt, %34, %69 : vector<2x1x8xf32>
    %cst_55 = arith.constant 0xFF800000 : f32
    %71 = vector.broadcast %cst_55 : f32 to vector<2x1x8xf32>
    %72 = arith.select %70, %68, %71 : vector<2x1x8xi1>, vector<2x1x8xf32>
    %cst_56 = arith.constant dense<0xFF800000> : vector<2x1xf32>
    %73 = vector.multi_reduction <maximumf>, %72, %cst_56 [2] : vector<2x1x8xf32> to vector<2x1xf32>
    %74 = vector.shape_cast %73 : vector<2x1xf32> to vector<2x1x1xf32>
    %75 = vector.broadcast %74 : vector<2x1x1xf32> to vector<2x1x8xf32>
    %76 = arith.subf %72, %75 : vector<2x1x8xf32>
    %77 = math.exp %76 : vector<2x1x8xf32>
    %cst_57 = arith.constant dense<0.000000e+00> : vector<2x1xf32>
    %78 = vector.multi_reduction <add>, %77, %cst_57 [2] : vector<2x1x8xf32> to vector<2x1xf32>
    %79 = vector.shape_cast %78 : vector<2x1xf32> to vector<2x1x1xf32>
    %80 = vector.broadcast %79 : vector<2x1x1xf32> to vector<2x1x8xf32>
    %81 = arith.divf %77, %80 : vector<2x1x8xf32>
    %c0_58 = arith.constant 0 : index
    %c0_59 = arith.constant 0 : index
    %c0_60 = arith.constant 0 : index
    %82 = vector.load %arg6[%c0_58, %c0_59, %c0_60] : memref<2x1x8xf32, #tpu.memory_space<vmem>>, vector<2x1x8xf32>
    tpu.vector_store %arg6[%c0_58, %c0_59, %c0_60], %81 {strides = array<i32>} : memref<2x1x8xf32, #tpu.memory_space<vmem>>, vector<2x1x8xf32>,
    "tpu.trace_start"() <{level = 10 : i32, message = "bql,bld->bqd"}> : () -> ()
    %cst_61 = arith.constant dense<0.000000e+00> : vector<2x1x32xf32>
    %83 = tpu.matmul %81, %26, %cst_61 {dimension_numbers = #tpu.dot_dimension_numbers<[2], [1], [1], [2], [0, 0, 0, 1, 1, 2], [0], [0]>} : vector<2x1x8xf32>, vector<2x8x32xf32>, vector<2x1x32xf32> -> vector<2x1x32xf32>
    "tpu.trace_stop"() : () -> ()
    %c0_62 = arith.constant 0 : index
    %c0_63 = arith.constant 0 : index
    %c0_64 = arith.constant 0 : index
    %84 = vector.load %arg5[%c0_62, %c0_63, %c0_64] : memref<2x1x32xf32, #tpu.memory_space<vmem>>, vector<2x1x32xf32>
    tpu.vector_store %arg5[%c0_62, %c0_63, %c0_64], %83 {strides = array<i32>} : memref<2x1x32xf32, #tpu.memory_space<vmem>>, vector<2x1x32xf32>,
    return
  }
  func.func @transform_0(%arg0: i32) -> (i32, i32, i32) {
    %c0_i32 = arith.constant 0 : i32
    %c0_i32_0 = arith.constant 0 : i32
    %c0_i32_1 = arith.constant 0 : i32
    return %arg0, %c0_i32, %c0_i32_0 : i32, i32, i32
  }
  func.func @transform_1(%arg0: i32) -> (i32, i32) {
    %c0_i32 = arith.constant 0 : i32
    %c0_i32_0 = arith.constant 0 : i32
    %c0_i32_1 = arith.constant 0 : i32
    return %c0_i32, %c0_i32_0 : i32, i32
  }
  func.func @transform_2(%arg0: i32) -> (i32, i32) {
    %c0_i32 = arith.constant 0 : i32
    %c0_i32_0 = arith.constant 0 : i32
    %c0_i32_1 = arith.constant 0 : i32
    return %c0_i32, %c0_i32_0 : i32, i32
  }
  func.func @transform_3(%arg0: i32) -> (i32, i32, i32) {
    %c0_i32 = arith.constant 0 : i32
    %c0_i32_0 = arith.constant 0 : i32
    %c0_i32_1 = arith.constant 0 : i32
    return %arg0, %c0_i32, %c0_i32_0 : i32, i32, i32
  }
  func.func @transform_4(%arg0: i32) -> (i32, i32, i32) {
    %c0_i32 = arith.constant 0 : i32
    %c0_i32_0 = arith.constant 0 : i32
    %c0_i32_1 = arith.constant 0 : i32
    return %arg0, %c0_i32, %c0_i32_0 : i32, i32, i32
  }
  func.func @transform_5(%arg0: i32) -> (i32, i32, i32) {
    %c0_i32 = arith.constant 0 : i32
    %c0_i32_0 = arith.constant 0 : i32
    %c0_i32_1 = arith.constant 0 : i32
    return %arg0, %c0_i32, %c0_i32_0 : i32, i32, i32
  }
}

</mosaic_0001>

<bundles_post_ra>
// kernel: tpu_custom_call.1
= control target key start
LH: loop header
LB: loop body
LE: loop exit
PB: predicated region body
PF: predicated region fallthrough
CT: control target
= control target key end

     0   :  { %11 = vsyncpa [#allocation4], 0  ;;  %s1358_s0 = inlined_call_operand.hbm [shape: f32[2,8,32], index: 0, kind: input, shape index: {}]   ;;  %s1359_s1 = inlined_call_operand.hbm [shape: f32[3,32], index: 1, kind: input, shape index: {}]   ;;  %s1360_s2 = inlined_call_operand.hbm [shape: f32[4,32], index: 2, kind: input, shape index: {}]   ;;  %s1361_s3 = inlined_call_operand.vmem [shape: f32[2,2,8], index: 3, kind: input, shape index: {}]   ;;  %s1362_s4 = inlined_call_operand.hbm [shape: f32[2,1,32], index: 4, kind: output, shape index: {0}]   ;;  %s1363_s5 = inlined_call_operand.hbm [shape: f32[2,1,8], index: 5, kind: output, shape index: {1}]  }
   0x1   :  { %12 = vsyncpa [#allocation7], 0 }
   0x2   :  { %13 = vsyncpa [#allocation5], 0 }
   0x3   :  { %14 = vsyncpa [#allocation11], 0  ;;  %s1220_s18 = smov [#allocation6]   ;;  %s1221_s20 = smov [#allocation3]  }
   0x4   :  { %s33_s19 = sshll.u32 %s1220_s18, 4  ;;  %s20_s21 = sshll.u32 %s1221_s20, 4  ;;  %s34_s19 = int_to_ptr.vmem [resolvable:$true] %s33_s19  ;;  %s21_s21 = int_to_ptr.vmem [resolvable:$true] %s20_s21 }
   0x5   :  { %s1120_s22 = scalar_lea.vmem %s34_s19, 64  ;;  %p1125_p1 = scmp.lt.s32.totalorder %s34_s19, %s34_s19 }
   0x6   :  { %p1121_p0 = scmp.ne.s32.totalorder %s34_s19, %s1120_s22  ;;  %p1126_p2 = scmp.lt.s32.totalorder %s1120_s22, %s1120_s22 }
   0x8   :  { %p1127_p3 = por %p1126_p2, %p1125_p1 }
   0xa   :  { %p1128_p4 = pnand %p1127_p3, %p1121_p0 }
   0xc   :  { %1131 = shalt.err (!%p1128_p4)
}
   0xd   :  { %36 = dma.hbm_to_vmem [thread:$0]  %s1359_s1, 64, %s34_s19, [#allocation7]  }
   0xe   :  { %s1140_s25 = scalar_lea.vmem %s21_s21, 256  ;;  %p1145_p6 = scmp.lt.s32.totalorder %s21_s21, %s21_s21 }
   0xf   :  { %p1141_p5 = scmp.ne.s32.totalorder %s21_s21, %s1140_s25  ;;  %p1146_p7 = scmp.lt.s32.totalorder %s1140_s25, %s1140_s25 }
  0x11   :  { %p1147_p8 = por %p1146_p7, %p1145_p6 }
  0x13   :  { %p1148_p9 = pnand %p1147_p8, %p1141_p5 }
  0x15   :  { %1151 = shalt.err (!%p1148_p9)
}
  0x16   :  { %s1222_s26 = smov 128   ;;  %s1223_s27 = smov 8  }
  0x17   :  { %26 = dma.hbm_to_vmem [thread:$0]  %s1358_s0, 256, %s21_s21, [#allocation4], %s1222_s26, %s1222_s26, %s1223_s27  }
  0x18   :  { %s1224_s30 = smov [#allocation8]  }
  0x19   :  { %s43_s6 = sshll.u32 %s1224_s30, 4  ;;  %s44_s6 = int_to_ptr.vmem [resolvable:$true] %s43_s6 }
  0x1a   :  { %s1160_s7 = scalar_lea.vmem %s44_s6, 64  ;;  %p1165_p11 = scmp.lt.s32.totalorder %s44_s6, %s44_s6 }
  0x1b   :  { %p1161_p10 = scmp.ne.s32.totalorder %s44_s6, %s1160_s7  ;;  %p1166_p12 = scmp.lt.s32.totalorder %s1160_s7, %s1160_s7 }
  0x1d   :  { %p1167_p13 = por %p1166_p12, %p1165_p11 }
  0x1f   :  { %p1168_p0 = pnand %p1167_p13, %p1161_p10 }
  0x21   :  { %1171 = shalt.err (!%p1168_p0)
}
  0x22   :  { %46 = dma.hbm_to_vmem [thread:$0]  %s1360_s2, 64, %s44_s6, [#allocation7]  }
  0x23   :  { %1212 = dma.done.wait [#allocation4], 256  }
  0x24   :  { %1213 = vsyncadd [#allocation4], 4294967040 }
  0x25   :  { %1214 = dma.done.wait [#allocation7], 128  }
  0x26   :  { %1215 = vsyncadd [#allocation7], 4294967168  ;;  %v1225_v0 = vmov 0.0   ;;  %vm1226_vm0 = vmmov 0   ;;  %vm64_vm1 = vcmask 261120   ;;  %v58_v2 = vld [vmem:[#allocation3] sm:$0xff]  ;;  %v702_v45 = vlaneseq }
  0x27   :  { %1034 = vmatprep.subr.mxu0 %v1225_v0  ;;  %1039 = vmatprep.subr.mxu1 %v1225_v0  ;;  %v63_v1 = vld [vmem:[#allocation8] sm:$0xf]  ;;  %v59_v3 = vld [vmem:[#allocation3 + $0x8] sm:$0xff]  ;;  %vm220_vm2 = vcmask 1043456   ;;  %vm216_vm3 = vcmask 31744   ;;  %vm716_vm4 = vcmask 90112  }
  0x28   :  { %1036 = vmatprep.mubr.msk.f32.mxu0 %vm1226_vm0, %v1225_v0  ;;  %1041 = vmatprep.mubr.msk.f32.mxu1 %vm1226_vm0, %v1225_v0  ;;  %v1009_v28 = vld [vmem:[#allocation6] ss:$0 sm:$0xff]  ;;  %v1010_v32 = vld [vmem:[#allocation6 + $0x1] ss:$0 sm:$0xff]  ;;  %v1011_v38 = vld [vmem:[#allocation6 + $0x2] ss:$0 sm:$0xff] }
  0x29   :  { %1035 = vmatpush3.xpose.msk.msra.mxu0 %vm64_vm1, %v63_v1  ;;  %1040 = vmatpush3.xpose.msk.msra.mxu1 %vm64_vm1, %v63_v1  ;;  %717 = vst.msk [vmem:[#allocation2] sm:$0x1] %vm716_vm4, %v1225_v0  ;;  %718 = vst.msk [vmem:[#allocation2 + $0x1] sm:$0x1] %vm716_vm4, %v1225_v0  ;;  %v703_v46 = vand.u32 127, %v702_v45  ;;  %v705_v47 = vshrl.u32 %v702_v45, 7 }
  0x2a   :  { %1044 = vmatprep.subr.mxu0 %v1225_v0  ;;  %1049 = vmatprep.subr.mxu1 %v1225_v0  ;;  %v1328_v49 = vld [vmem:[%s1361_s3] sm:$0x1]  ;;  %v695_v52 = vld [vmem:[%s1361_s3 + $0x2] sm:$0x1]  ;;  %s1227_s11 = smov 2   ;;  %vm727_vm7 = vcmask 73744  }
  0x2b   :  { %v706_v48 = vsub.s32 %v703_v46, %v705_v47  ;;  %vm698_vm5 = vcmp.gt.f32.partialorder %v1328_v49, 0.5  ;;  %vm699_vm6 = vcmp.gt.f32.partialorder %v695_v52, 0.5  ;;  %s1228_s12 = smov 127   ;;  %s1229_s13 = smov 124   ;;  %vm784_vm9 = vcmask 57344  }
  0x2c   :  { %1037 = vmatmul.mubr.msk.f32.vlgmr.msra.gmra.mxu0 %vm64_vm1, %v58_v2  ;;  %1042 = vmatmul.mubr.msk.f32.vlgmr.msra.gmra.mxu1 %vm64_vm1, %v59_v3  ;;  %s1230_s14 = smov 126   ;;  %s1231_s15 = smov 125   ;;  %vm809_vm11 = vcmask 64512  }
  0x2d   :  { %1045 = vmatpush3.msk.msra.mxu0 %vm220_vm2, %v63_v1  ;;  %1046 = vmatprep.mubr.msk.f32.mxu0 %vm1226_vm0, %v1225_v0 }
  0x2e   :  { %1050 = vmatpush3.msk.msra.mxu1 %vm220_vm2, %v63_v1  ;;  %1051 = vmatprep.mubr.msk.f32.mxu1 %vm1226_vm0, %v1225_v0 }
  0x2f   :  { %1054 = vmatprep.subr.mxu0 %v1225_v0  ;;  %1059 = vmatprep.subr.mxu1 %v1225_v0 }
  0xec   :  { %v137_v4 = vpop.f32.mrf.mxu0  ;;  %v210_v5 = vpop.f32.mrf.mxu1 }
  0xed   :  { %v214_v6 = vmul.f32 0.125, %v137_v4  ;;  %v215_v7 = vmul.f32 0.125, %v210_v5 }
  0xee   :  { %v1038_v8 = vpop.f32.mrf.mxu0  ;;  %v1043_v9 = vpop.f32.mrf.mxu1 }
  0xef   :  { %1047 = vmatmul.mubr.msk.f32.vlgmr.msra.gmra.mxu0 %vm216_vm3, %v214_v6  ;;  %1052 = vmatmul.mubr.msk.f32.vlgmr.msra.gmra.mxu1 %vm216_vm3, %v215_v7 }
  0xf0   :  { %1055 = vmatpush3.xpose.msk.msra.mxu0 %vm64_vm1, %v63_v1  ;;  %1060 = vmatpush3.xpose.msk.msra.mxu1 %vm64_vm1, %v63_v1 }
  0xf1   :  { %1056 = vmatprep.mubr.msk.f32.mxu0 %vm1226_vm0, %v1225_v0  ;;  %1061 = vmatprep.mubr.msk.f32.mxu1 %vm1226_vm0, %v1225_v0 }
  0xf2   :  { %1064 = vmatprep.subr.mxu0 %v1225_v0  ;;  %1069 = vmatprep.subr.mxu1 %v1225_v0 }
 0x1af   :  { %v289_v10 = vpop.f32.mrf.mxu0  ;;  %v362_v11 = vpop.f32.mrf.mxu1 }
 0x1b0   :  { %v366_v12 = vsub.f32 %v58_v2, %v289_v10  ;;  %v367_v13 = vsub.f32 %v59_v3, %v362_v11 }
 0x1b1   :  { %v1048_v14 = vpop.f32.mrf.mxu0  ;;  %v1053_v15 = vpop.f32.mrf.mxu1 }
 0x1b2   :  { %v368_v16 = vmul.f32 %v366_v12, %v366_v12  ;;  %v369_v17 = vmul.f32 %v367_v13, %v367_v13 }
 0x1b4   :  { %1057 = vmatmul.mubr.msk.f32.vlgmr.msra.gmra.mxu0 %vm64_vm1, %v368_v16  ;;  %1062 = vmatmul.mubr.msk.f32.vlgmr.msra.gmra.mxu1 %vm64_vm1, %v369_v17  ;;  %v696_v16 = vld [vmem:[%s1361_s3 + $0x1] sm:$0x1] }
 0x1b5   :  { %1065 = vmatpush3.msk.msra.mxu0 %vm220_vm2, %v63_v1  ;;  %1066 = vmatprep.mubr.msk.f32.mxu0 %vm1226_vm0, %v1225_v0  ;;  %vm780_vm10 = vcmp.gt.f32.partialorder %v696_v16, 0.5 }
 0x1b6   :  { %1070 = vmatpush3.msk.msra.mxu1 %vm220_vm2, %v63_v1  ;;  %1071 = vmatprep.mubr.msk.f32.mxu1 %vm1226_vm0, %v1225_v0 }
 0x1b7   :  { %1074 = vmatprep.subr.mxu0 %v1225_v0  ;;  %1079 = vmatprep.subr.mxu1 %v1225_v0 }
 0x274   :  { %v439_v18 = vpop.f32.mrf.mxu0  ;;  %v512_v19 = vpop.f32.mrf.mxu1 }
 0x275   :  { %v516_v20 = vmul.f32 0.125, %v439_v18  ;;  %v517_v21 = vmul.f32 0.125, %v512_v19 }
 0x276   :  { %v1058_v22 = vpop.f32.mrf.mxu0  ;;  %v1063_v23 = vpop.f32.mrf.mxu1 }
 0x277   :  { %v518_v24 = vadd.f32 1e-05, %v516_v20  ;;  %v519_v25 = vadd.f32 1e-05, %v517_v21 }
 0x279   :  { %1100 = vrsqrt.f32 %v518_v24 }
 0x27a   :  { %1102 = vrsqrt.f32 %v519_v25 }
 0x286   :  { %v1101_v26 = vpop.eup %1100 }
 0x287   :  { %v1103_v27 = vpop.eup %1102  ;;  %1067 = vmatmul.mubr.msk.f32.vlgmr.msra.gmra.mxu0 %vm216_vm3, %v1101_v26 }
 0x288   :  { %1072 = vmatmul.mubr.msk.f32.vlgmr.msra.gmra.mxu1 %vm216_vm3, %v1103_v27  ;;  %1076 = vmatprep.mubr.msk.f32.mxu0 %vm1226_vm0, %v1225_v0 }
 0x289   :  { %1081 = vmatprep.mubr.msk.f32.mxu1 %vm1226_vm0, %v1225_v0 }
 0x347   :  { %v591_v29 = vpop.f32.mrf.mxu0 }
 0x348   :  { %v668_v30 = vmul.f32 %v591_v29, %v366_v12  ;;  %v664_v31 = vpop.f32.mrf.mxu1  ;;  %v697_v12 = vld [vmem:[%s1361_s3 + $0x3] sm:$0x1]  ;;  %s1232_s3 = smov [#allocation10]  }
 0x349   :  { %v669_v33 = vmul.f32 %v664_v31, %v367_v13  ;;  %v1068_v34 = vpop.f32.mrf.mxu0  ;;  %vm781_vm8 = vcmp.gt.f32.partialorder %v697_v12, 0.5  ;;  %s976_s20 = sshll.u32 %s1232_s3, 4  ;;  %s977_s20 = int_to_ptr.vmem [resolvable:$true] %s976_s20 }
 0x34a   :  { %v674_v35 = vmul.f32 %v1009_v28, %v668_v30  ;;  %v1073_v36 = vpop.f32.mrf.mxu1  ;;  %s1172_s21 = scalar_lea.vmem %s977_s20, 32  ;;  %p1177_p2 = scmp.lt.s32.totalorder %s977_s20, %s977_s20 }
 0x34b   :  { %v675_v37 = vmul.f32 %v1009_v28, %v669_v33  ;;  %p1173_p1 = scmp.ne.s32.totalorder %s977_s20, %s1172_s21  ;;  %p1178_p3 = scmp.lt.s32.totalorder %s1172_s21, %s1172_s21 }
 0x34c   :  { %v680_v39 = vadd.f32 %v1010_v32, %v674_v35 }
 0x34d   :  { %v681_v40 = vadd.f32 %v1010_v32, %v675_v37  ;;  %p1179_p4 = por %p1178_p3, %p1177_p2 }
 0x34e   :  { %1075 = vmatpush3.msra.mxu0 %v680_v39  ;;  %v686_v41 = vmul.f32 %v1011_v38, %v680_v39 }
 0x34f   :  { %1080 = vmatpush3.msra.mxu1 %v681_v40  ;;  %v687_v43 = vmul.f32 %v1011_v38, %v681_v40  ;;  %p1180_p5 = pnand %p1179_p4, %p1173_p1 }
 0x350   :  { %v688_v42 = vsel %vm64_vm1, %v686_v41, 0.0 }
 0x351   :  { %689 = vadd.xlane.f32.xlu0 %v688_v42  ;;  %v691_v44 = vsel %vm64_vm1, %v687_v43, 0.0 }
 0x355   :  { %692 = vadd.xlane.f32.xlu0 %v691_v44 }
 0x3da   :  { %v690_v50 = vpop.xlane.xlu0 %689 }
 0x3db   :  { %v707_v51 = vrot.slane %v690_v50, %v706_v48 }
 0x3dd   :  { %v714_v53 = vsel %vm698_vm5, %v707_v51, 0.0 }
 0x3de   :  { %721 = vrot.lane.b32.xlu1 %v714_v53, %s1227_s11  ;;  %v693_v54 = vpop.xlane.xlu0 %692 }
 0x3df   :  { %v711_v55 = vrot.slane %v693_v54, %v706_v48 }
 0x3e1   :  { %v715_v56 = vsel %vm699_vm6, %v711_v55, 0.0 }
 0x3e2   :  { %723 = vrot.lane.b32.xlu1 %v715_v56, %s1227_s11 }
 0x450   :  { %v722_v57 = vpop.permute.xlu1 %721 }
 0x451   :  { %728 = vst.msk [vmem:[#allocation2] sm:$0x1] %vm727_vm7, %v722_v57 }
 0x454   :  { %v724_v58 = vpop.permute.xlu1 %723 }
 0x455   :  { %729 = vst.msk [vmem:[#allocation2 + $0x1] sm:$0x1] %vm727_vm7, %v724_v58 }
 0x458   :  { %v730_v59 = vld [vmem:[#allocation2] sm:$0x1] }
 0x459   :  { %v736_v60 = vmul.f32 0.2218413, %v730_v59  ;;  %v748_v0 = vmul.f32 0.25137913, %v730_v59  ;;  %v732_v2 = vmul.f32 0.15246914, %v730_v59 }
 0x45b   :  { %740 = vrot.lane.b32.xlu0 %v736_v60, %s1228_s12 }
 0x45c   :  { %v731_v61 = vld [vmem:[#allocation2 + $0x1] sm:$0x1] }
 0x45d   :  { %v737_v62 = vmul.f32 0.2218413, %v731_v61  ;;  %v733_v63 = vmul.f32 0.15246914, %v731_v61  ;;  %v749_v1 = vmul.f32 0.25137913, %v731_v61 }
 0x45f   :  { %742 = vrot.lane.b32.xlu1 %v737_v62, %s1228_s12  ;;  %772 = vrot.lane.b32.xlu0 %v733_v63, %s1229_s13 }
 0x463   :  { %752 = vrot.lane.b32.xlu1 %v748_v0, %s1230_s14 }
 0x467   :  { %754 = vrot.lane.b32.xlu1 %v749_v1, %s1230_s14 }
 0x46b   :  { %760 = vrot.lane.b32.xlu1 %v736_v60, %s1231_s15 }
 0x46f   :  { %762 = vrot.lane.b32.xlu1 %v737_v62, %s1231_s15 }
 0x473   :  { %770 = vrot.lane.b32.xlu1 %v732_v2, %s1229_s13 }
 0x4cd   :  { %v741_v6 = vpop.permute.xlu0 %740 }
 0x4ce   :  { %v746_v9 = vadd.f32 %v741_v6, %v732_v2 }
 0x4d1   :  { %v743_v3 = vpop.permute.xlu1 %742  ;;  %v773_v15 = vpop.permute.xlu0 %772 }
 0x4d2   :  { %v747_v8 = vadd.f32 %v743_v3, %v733_v63 }
 0x4d5   :  { %v753_v4 = vpop.permute.xlu1 %752 }
 0x4d6   :  { %v758_v13 = vadd.f32 %v753_v4, %v746_v9 }
 0x4d9   :  { %v755_v5 = vpop.permute.xlu1 %754 }
 0x4da   :  { %v759_v10 = vadd.f32 %v755_v5, %v747_v8 }
 0x4dd   :  { %v761_v7 = vpop.permute.xlu1 %760 }
 0x4de   :  { %v766_v17 = vadd.f32 %v761_v7, %v758_v13 }
 0x4e1   :  { %v763_v11 = vpop.permute.xlu1 %762 }
 0x4e2   :  { %v767_v14 = vadd.f32 %v763_v11, %v759_v10 }
 0x4e4   :  { %v777_v18 = vadd.f32 %v773_v15, %v767_v14 }
 0x4e5   :  { %v771_v19 = vpop.permute.xlu1 %770 }
 0x4e6   :  { %v776_v20 = vadd.f32 %v771_v19, %v766_v17  ;;  %v779_v21 = vsel %vm699_vm6, %v777_v18, 0.0 }
 0x4e7   :  { %v783_v22 = vsel %vm781_vm8, %v779_v21, -inf }
 0x4e8   :  { %v788_v23 = vsel %vm784_vm9, %v783_v22, -inf  ;;  %v778_v24 = vsel %vm698_vm5, %v776_v20, 0.0 }
 0x4e9   :  { %789 = vmax.xlane.f32.xlu0 %v788_v23  ;;  %v782_v25 = vsel %vm780_vm10, %v778_v24, -inf }
 0x4ea   :  { %v785_v26 = vsel %vm784_vm9, %v782_v25, -inf }
 0x4eb   :  { %786 = vmax.xlane.f32.xlu1 %v785_v26 }
 0x572   :  { %v790_v27 = vpop.xlane.xlu0 %789 }
 0x573   :  { %v792_v28 = vsub.f32 %v783_v22, %v790_v27 }
 0x574   :  { %v787_v29 = vpop.xlane.xlu1 %786 }
 0x575   :  { %v795_v30 = vmul.f32 1.442695, %v792_v28  ;;  %v791_v31 = vsub.f32 %v782_v25, %v787_v29 }
 0x577   :  { %1104 = vpow2.f32 %v795_v30  ;;  %v793_v32 = vmul.f32 1.442695, %v791_v31 }
 0x579   :  { %1106 = vpow2.f32 %v793_v32 }
 0x584   :  { %v1105_v33 = vpop.eup %1104 }
 0x585   :  { %v800_v34 = vsel %vm784_vm9, %v1105_v33, 0.0 }
 0x586   :  { %v1107_v35 = vpop.eup %1106  ;;  %801 = vadd.xlane.f32.xlu1 %v800_v34 }
 0x587   :  { %v797_v36 = vsel %vm784_vm9, %v1107_v35, 0.0 }
 0x588   :  { %798 = vadd.xlane.f32.xlu0 %v797_v36 }
 0x60f   :  { %v802_v37 = vpop.xlane.xlu1 %801 }
 0x610   :  { %1108 = vrcp.f32 %v802_v37 }
 0x611   :  { %v799_v38 = vpop.xlane.xlu0 %798 }
 0x612   :  { %1110 = vrcp.f32 %v799_v38 }
 0x61d   :  { %v1109_v39 = vpop.eup %1108 }
 0x61e   :  { %v806_v40 = vmul.f32 %v1109_v39, %v1105_v33 }
 0x61f   :  { %v1111_v41 = vpop.eup %1110 }
 0x620   :  { %1082 = vmatmul.mubr.msk.f32.vlgmr.msra.gmra.mxu1 %vm809_vm11, %v806_v40  ;;  %808 = vst.msk [vmem:[#allocation10 + $0x1] sm:$0x1] %vm784_vm9, %v806_v40  ;;  %v804_v42 = vmul.f32 %v1111_v41, %v1107_v35 }
 0x622   :  { %1077 = vmatmul.mubr.msk.f32.vlgmr.msra.gmra.mxu0 %vm809_vm11, %v804_v42  ;;  %807 = vst.msk [vmem:[#allocation10] sm:$0x1] %vm784_vm9, %v804_v42 }
 0x623   :  { %1183 = shalt.err (!%p1180_p5)
}
 0x624   :  { %s1233_s22 = smov 16   ;;  %s1234_s23 = smov 1   ;;  %vm956_vm12 = vcmask 253952  }
 0x625   :  { %982 = dma.vmem_to_hbm [thread:$0]  %s977_s20, 32, %s1363_s5, [#allocation11], %s1233_s22, %s1233_s22, %s1234_s23  }
 0x626   :  { %s1235_s26 = smov [#allocation9]  }
 0x627   :  { %s964_s27 = sshll.u32 %s1235_s26, 4  ;;  %s965_s27 = int_to_ptr.vmem [resolvable:$true] %s964_s27 }
 0x628   :  { %s1192_s28 = scalar_lea.vmem %s965_s27, 32  ;;  %p1197_p7 = scmp.lt.s32.totalorder %s965_s27, %s965_s27 }
 0x629   :  { %p1193_p6 = scmp.ne.s32.totalorder %s965_s27, %s1192_s28  ;;  %p1198_p8 = scmp.lt.s32.totalorder %s1192_s28, %s1192_s28 }
 0x62b   :  { %p1199_p9 = por %p1198_p8, %p1197_p7 }
 0x62d   :  { %p1200_p10 = pnand %p1199_p9, %p1193_p6 }
 0x6e0   :  { %v952_v43 = vpop.f32.mrf.mxu1 }
 0x6e1   :  { %958 = vst.msk [vmem:[#allocation9 + $0x1] sm:$0x1] %vm956_vm12, %v952_v43 }
 0x6e2   :  { %v879_v44 = vpop.f32.mrf.mxu0  ;;  %v1083_v45 = vpop.f32.mrf.mxu1 }
 0x6e3   :  { %957 = vst.msk [vmem:[#allocation9] sm:$0x1] %vm956_vm12, %v879_v44 }
 0x6e4   :  { %v1078_v46 = vpop.f32.mrf.mxu0 }
 0x6e5   :  { %1203 = shalt.err (!%p1200_p10)
}
 0x6e6   :  { %970 = dma.vmem_to_hbm [thread:$0]  %s965_s27, 32, %s1362_s4, [#allocation5], %s1233_s22, %s1233_s22, %s1234_s23  }
 0x6e7   :  { %1216 = dma.done.wait [#allocation5], 32  }
 0x6e8   :  { %1217 = vsyncadd [#allocation5], 4294967264 }
 0x6e9   :  { %1218 = dma.done.wait [#allocation11], 32  }
 0x6ea   :  { %1219 = vsyncadd [#allocation11], 4294967264 }
 0x6eb   :  { %989 = vsyncpa [#allocation4], 1 }
 0x6ec   :  { %990 = vsyncpa [#allocation7], 1 }
 0x6ed   :  { %991 = vsyncpa [#allocation5], 1 }
 0x6ee   :  { %992 = vsyncpa [#allocation11], 1 }

</bundles_post_ra>
